<compile_context>
chip_gen: v7x
topology: tpu7x:2x2x1
jax: 0.10.0
libtpu: 0.0.40
codegen_flags: <defaults>
</compile_context>

<pallas_src>
import jax
import jax.numpy as jnp
from jax.experimental import pallas as pl
from jax.experimental.pallas import tpu as pltpu

LANE = 128      # vreg lane width / MXU column granule
SUBLANE = 8     # vreg sublane granule


def _round_up(n, m):
    return (n + m - 1) // m * m


def _choose_tile_m(B):
    """Batch tile: up to 512 rows, sublane-aligned, >=2 grid steps when possible."""
    if B <= SUBLANE:
        return B  # block == full batch dim (legal even when B < 8)
    # Aim for at least 2 grid steps so both v7x TensorCores get work.
    return min(512, _round_up(pl.cdiv(B, 2), SUBLANE))


def mlp_kernel(x_ref, w1_ref, b1_ref, w2_ref, b2_ref,
               w3_ref, b3_ref, w4_ref, b4_ref, o_ref):
    # x arrives as f32 straight from HBM; cast to bf16 on the VPU (free in an
    # HBM-bound pipeline). All matmuls accumulate in f32 on the MXU.
    x = x_ref[...].astype(jnp.bfloat16)

    h = jnp.dot(x, w1_ref[...], preferred_element_type=jnp.float32)
    h = jnp.maximum(h + b1_ref[...], 0.0)

    h = jnp.dot(h.astype(jnp.bfloat16), w2_ref[...],
                preferred_element_type=jnp.float32)
    h = jnp.maximum(h + b2_ref[...], 0.0)

    h = jnp.dot(h.astype(jnp.bfloat16), w3_ref[...],
                preferred_element_type=jnp.float32)
    h = jnp.maximum(h + b3_ref[...], 0.0)

    h = jnp.dot(h.astype(jnp.bfloat16), w4_ref[...],
                preferred_element_type=jnp.float32)
    # Real result lives in column 0 (padded weight/bias columns are exactly
    # zero); store only that column -> 4 B per output row of HBM traffic.
    o_ref[...] = (h + b4_ref[...])[:, 0:1]


def feedforward_nn(x, params):
    """x: (B, input_size) float32. params: f32 dict of (in,out) W and (1,out) b."""
    B, F = x.shape
    N_pad = LANE  # hidden widths 64/32/1 zero-padded to 128 (exact: ReLU(0)=0)

    tile_m = _choose_tile_m(B)
    grid_m = pl.cdiv(B, tile_m)

    def pad2(a, rows, cols):
        return jnp.pad(a, ((0, rows - a.shape[0]), (0, cols - a.shape[1])))

    # Weights/biases are tiny (~200 KiB total): pad/cast once, held VMEM-resident
    # across grid steps via constant index_maps. Zero pads are exact.
    w1 = pad2(params["w1"], F, N_pad).astype(jnp.bfloat16)      # (365, 128)
    w2 = pad2(params["w2"], N_pad, N_pad).astype(jnp.bfloat16)  # (128, 128)
    w3 = pad2(params["w3"], N_pad, N_pad).astype(jnp.bfloat16)
    w4 = pad2(params["w4"], N_pad, N_pad).astype(jnp.bfloat16)
    # Biases stay f32: added in the f32 accumulator.
    b1 = pad2(params["b1"], 1, N_pad)
    b2 = pad2(params["b2"], 1, N_pad)
    b3 = pad2(params["b3"], 1, N_pad)
    b4 = pad2(params["b4"], 1, N_pad)

    x_spec = pl.BlockSpec((tile_m, F), lambda i: (i, 0))          # K = full dim (365)
    out_spec = pl.BlockSpec((tile_m, 1), lambda i: (i, 0))        # 1 real column only
    const = lambda shape: pl.BlockSpec(shape, lambda i: (0, 0))   # VMEM-resident

    out = pl.pallas_call(
        mlp_kernel,
        out_shape=jax.ShapeDtypeStruct((grid_m * tile_m, 1), jnp.float32),
        grid=(grid_m,),
        in_specs=[
            x_spec,
            const(w1.shape), const(b1.shape),
            const(w2.shape), const(b2.shape),
            const(w3.shape), const(b3.shape),
            const(w4.shape), const(b4.shape),
        ],
        out_specs=out_spec,
        compiler_params=pltpu.CompilerParams(
            dimension_semantics=("parallel",)),
    )(x, w1, b1, w2, b2, w3, b3, w4, b4)

    # Trim the (possibly) padded tail rows (tail-block rows are independent
    # garbage and simply discarded here).
    return out[:B]


def init_params(key, input_size):
    """Deterministic init matching the torch module's layer shapes.

    Torch stores weights as (out, in); we store the transpose (in, out) so the
    kernel does y = x @ W + b.
    """
    sizes = [(input_size, 128), (128, 64), (64, 32), (32, 1)]
    params = {}
    for i, (fan_in, fan_out) in enumerate(sizes, start=1):
        key, kw, kb = jax.random.split(key, 3)
        bound = 1.0 / jnp.sqrt(fan_in)  # same range as torch Linear default init
        params[f"w{i}"] = jax.random.uniform(
            kw, (fan_in, fan_out), jnp.float32, minval=-bound, maxval=bound)
        params[f"b{i}"] = jax.random.uniform(
            kb, (1, fan_out), jnp.float32, minval=-bound, maxval=bound)
    return params


def reference_forward(x, params):
    h = jnp.maximum(x @ params["w1"] + params["b1"], 0.0)
    h = jnp.maximum(h @ params["w2"] + params["b2"], 0.0)
    h = jnp.maximum(h @ params["w3"] + params["b3"], 0.0)
    return h @ params["w4"] + params["b4"]


if __name__ == "__main__":
    # input_size = sequence_length * len(weather_var_types) = 365 * 1 = 365
    sequence_length = 365
    num_var_types = 1
    input_size = sequence_length * num_var_types

    key = jax.random.PRNGKey(0)
    key, kx = jax.random.split(key)
    params = init_params(key, input_size)

    # Small batch: single grid step.
    x_small = jax.random.normal(kx, (8, input_size), jnp.float32)
    out_small = jax.block_until_ready(feedforward_nn(x_small, params))
    ref_small = reference_forward(x_small, params)
    assert out_small.shape == (8, 1), out_small.shape
    # bf16 matmul operands vs. f32 reference -> loosened tolerance.
    assert jnp.allclose(out_small, ref_small, atol=5e-2, rtol=5e-2), "small-batch mismatch"

    # Non-divisible batch: exercises the multi-tile cdiv grid and the
    # discarded garbage tail rows.
    key, kx2 = jax.random.split(key)
    x_big = jax.random.normal(kx2, (300, input_size), jnp.float32)
    out_big = jax.block_until_ready(feedforward_nn(x_big, params))
    ref_big = reference_forward(x_big, params)
    assert out_big.shape == (300, 1), out_big.shape
    assert jnp.allclose(out_big, ref_big, atol=5e-2, rtol=5e-2), "multi-tile mismatch"

    print("KERNEL_OK")
</pallas_src>

<mosaic_0001>
module attributes {stable_mosaic.version = 11 : i64} {
  func.func @mlp_kernel(%arg0: i32, %arg1: memref<8x365xf32, #tpu.memory_space<vmem>>, %arg2: memref<365x128xbf16, #tpu.memory_space<vmem>>, %arg3: memref<1x128xf32, #tpu.memory_space<vmem>>, %arg4: memref<128x128xbf16, #tpu.memory_space<vmem>>, %arg5: memref<1x128xf32, #tpu.memory_space<vmem>>, %arg6: memref<128x128xbf16, #tpu.memory_space<vmem>>, %arg7: memref<1x128xf32, #tpu.memory_space<vmem>>, %arg8: memref<128x128xbf16, #tpu.memory_space<vmem>>, %arg9: memref<1x128xf32, #tpu.memory_space<vmem>>, %arg10: memref<8x1xf32, #tpu.memory_space<vmem>>) attributes {dimension_semantics = [#tpu.dimension_semantics<parallel>], iteration_bounds = array<i64: 1>, scalar_prefetch = 0 : i64, scratch_operands = 0 : i64, tpu.core_type = #tpu.core_type<tc>, window_params = [{transform_indices = @transform_0, window_bounds = array<i64: 8, 365>}, {pipeline_mode = #tpu.pipeline_mode<synchronous>, transform_indices = @transform_1, window_bounds = array<i64: 365, 128>}, {pipeline_mode = #tpu.pipeline_mode<synchronous>, transform_indices = @transform_2, window_bounds = array<i64: 1, 128>}, {pipeline_mode = #tpu.pipeline_mode<synchronous>, transform_indices = @transform_3, window_bounds = array<i64: 128, 128>}, {pipeline_mode = #tpu.pipeline_mode<synchronous>, transform_indices = @transform_4, window_bounds = array<i64: 1, 128>}, {pipeline_mode = #tpu.pipeline_mode<synchronous>, transform_indices = @transform_5, window_bounds = array<i64: 128, 128>}, {pipeline_mode = #tpu.pipeline_mode<synchronous>, transform_indices = @transform_6, window_bounds = array<i64: 1, 128>}, {pipeline_mode = #tpu.pipeline_mode<synchronous>, transform_indices = @transform_7, window_bounds = array<i64: 128, 128>}, {pipeline_mode = #tpu.pipeline_mode<synchronous>, transform_indices = @transform_8, window_bounds = array<i64: 1, 128>}, {transform_indices = @transform_9, window_bounds = array<i64: 8, 1>}]} {
    %c0 = arith.constant 0 : index
    %c0_0 = arith.constant 0 : index
    %0 = vector.load %arg1[%c0, %c0_0] : memref<8x365xf32, #tpu.memory_space<vmem>>, vector<8x365xf32>
    %1 = arith.truncf %0 : vector<8x365xf32> to vector<8x365xbf16>
    %c0_1 = arith.constant 0 : index
    %c0_2 = arith.constant 0 : index
    %2 = vector.load %arg2[%c0_1, %c0_2] : memref<365x128xbf16, #tpu.memory_space<vmem>>, vector<365x128xbf16>
    %cst = arith.constant dense<0.000000e+00> : vector<8x128xf32>
    %3 = tpu.matmul %1, %2, %cst {dimension_numbers = #tpu.dot_dimension_numbers<[1], [0], [0], [1], [0, 0, 1, 1], [], []>} : vector<8x365xbf16>, vector<365x128xbf16>, vector<8x128xf32> -> vector<8x128xf32>
    %c0_3 = arith.constant 0 : index
    %c0_4 = arith.constant 0 : index
    %4 = vector.load %arg3[%c0_3, %c0_4] : memref<1x128xf32, #tpu.memory_space<vmem>>, vector<1x128xf32>
    %5 = vector.broadcast %4 : vector<1x128xf32> to vector<8x128xf32>
    %6 = arith.addf %3, %5 : vector<8x128xf32>
    %cst_5 = arith.constant 0.000000e+00 : f32
    %7 = vector.broadcast %cst_5 : f32 to vector<8x128xf32>
    %8 = arith.maximumf %6, %7 : vector<8x128xf32>
    %9 = arith.truncf %8 : vector<8x128xf32> to vector<8x128xbf16>
    %c0_6 = arith.constant 0 : index
    %c0_7 = arith.constant 0 : index
    %10 = vector.load %arg4[%c0_6, %c0_7] : memref<128x128xbf16, #tpu.memory_space<vmem>>, vector<128x128xbf16>
    %cst_8 = arith.constant dense<0.000000e+00> : vector<8x128xf32>
    %11 = tpu.matmul %9, %10, %cst_8 {dimension_numbers = #tpu.dot_dimension_numbers<[1], [0], [0], [1], [0, 0, 1, 1], [], []>} : vector<8x128xbf16>, vector<128x128xbf16>, vector<8x128xf32> -> vector<8x128xf32>
    %c0_9 = arith.constant 0 : index
    %c0_10 = arith.constant 0 : index
    %12 = vector.load %arg5[%c0_9, %c0_10] : memref<1x128xf32, #tpu.memory_space<vmem>>, vector<1x128xf32>
    %13 = vector.broadcast %12 : vector<1x128xf32> to vector<8x128xf32>
    %14 = arith.addf %11, %13 : vector<8x128xf32>
    %cst_11 = arith.constant 0.000000e+00 : f32
    %15 = vector.broadcast %cst_11 : f32 to vector<8x128xf32>
    %16 = arith.maximumf %14, %15 : vector<8x128xf32>
    %17 = arith.truncf %16 : vector<8x128xf32> to vector<8x128xbf16>
    %c0_12 = arith.constant 0 : index
    %c0_13 = arith.constant 0 : index
    %18 = vector.load %arg6[%c0_12, %c0_13] : memref<128x128xbf16, #tpu.memory_space<vmem>>, vector<128x128xbf16>
    %cst_14 = arith.constant dense<0.000000e+00> : vector<8x128xf32>
    %19 = tpu.matmul %17, %18, %cst_14 {dimension_numbers = #tpu.dot_dimension_numbers<[1], [0], [0], [1], [0, 0, 1, 1], [], []>} : vector<8x128xbf16>, vector<128x128xbf16>, vector<8x128xf32> -> vector<8x128xf32>
    %c0_15 = arith.constant 0 : index
    %c0_16 = arith.constant 0 : index
    %20 = vector.load %arg7[%c0_15, %c0_16] : memref<1x128xf32, #tpu.memory_space<vmem>>, vector<1x128xf32>
    %21 = vector.broadcast %20 : vector<1x128xf32> to vector<8x128xf32>
    %22 = arith.addf %19, %21 : vector<8x128xf32>
    %cst_17 = arith.constant 0.000000e+00 : f32
    %23 = vector.broadcast %cst_17 : f32 to vector<8x128xf32>
    %24 = arith.maximumf %22, %23 : vector<8x128xf32>
    %25 = arith.truncf %24 : vector<8x128xf32> to vector<8x128xbf16>
    %c0_18 = arith.constant 0 : index
    %c0_19 = arith.constant 0 : index
    %26 = vector.load %arg8[%c0_18, %c0_19] : memref<128x128xbf16, #tpu.memory_space<vmem>>, vector<128x128xbf16>
    %cst_20 = arith.constant dense<0.000000e+00> : vector<8x128xf32>
    %27 = tpu.matmul %25, %26, %cst_20 {dimension_numbers = #tpu.dot_dimension_numbers<[1], [0], [0], [1], [0, 0, 1, 1], [], []>} : vector<8x128xbf16>, vector<128x128xbf16>, vector<8x128xf32> -> vector<8x128xf32>
    %c0_21 = arith.constant 0 : index
    %c0_22 = arith.constant 0 : index
    %28 = vector.load %arg9[%c0_21, %c0_22] : memref<1x128xf32, #tpu.memory_space<vmem>>, vector<1x128xf32>
    %29 = vector.broadcast %28 : vector<1x128xf32> to vector<8x128xf32>
    %30 = arith.addf %27, %29 : vector<8x128xf32>
    %31 = vector.extract_strided_slice %30 {offsets = [0, 0], sizes = [8, 1], strides = [1, 1]} : vector<8x128xf32> to vector<8x1xf32>
    %c0_23 = arith.constant 0 : index
    %c0_24 = arith.constant 0 : index
    %32 = vector.load %arg10[%c0_23, %c0_24] : memref<8x1xf32, #tpu.memory_space<vmem>>, vector<8x1xf32>
    tpu.vector_store %arg10[%c0_23, %c0_24], %31 {strides = array<i32>} : memref<8x1xf32, #tpu.memory_space<vmem>>, vector<8x1xf32>,
    return
  }
  func.func @transform_0(%arg0: i32) -> (i32, i32) {
    %c0_i32 = arith.constant 0 : i32
    %c0_i32_0 = arith.constant 0 : i32
    return %arg0, %c0_i32 : i32, i32
  }
  func.func @transform_1(%arg0: i32) -> (i32, i32) {
    %c0_i32 = arith.constant 0 : i32
    %c0_i32_0 = arith.constant 0 : i32
    %c0_i32_1 = arith.constant 0 : i32
    return %c0_i32, %c0_i32_0 : i32, i32
  }
  func.func @transform_2(%arg0: i32) -> (i32, i32) {
    %c0_i32 = arith.constant 0 : i32
    %c0_i32_0 = arith.constant 0 : i32
    %c0_i32_1 = arith.constant 0 : i32
    return %c0_i32, %c0_i32_0 : i32, i32
  }
  func.func @transform_3(%arg0: i32) -> (i32, i32) {
    %c0_i32 = arith.constant 0 : i32
    %c0_i32_0 = arith.constant 0 : i32
    %c0_i32_1 = arith.constant 0 : i32
    return %c0_i32, %c0_i32_0 : i32, i32
  }
  func.func @transform_4(%arg0: i32) -> (i32, i32) {
    %c0_i32 = arith.constant 0 : i32
    %c0_i32_0 = arith.constant 0 : i32
    %c0_i32_1 = arith.constant 0 : i32
    return %c0_i32, %c0_i32_0 : i32, i32
  }
  func.func @transform_5(%arg0: i32) -> (i32, i32) {
    %c0_i32 = arith.constant 0 : i32
    %c0_i32_0 = arith.constant 0 : i32
    %c0_i32_1 = arith.constant 0 : i32
    return %c0_i32, %c0_i32_0 : i32, i32
  }
  func.func @transform_6(%arg0: i32) -> (i32, i32) {
    %c0_i32 = arith.constant 0 : i32
    %c0_i32_0 = arith.constant 0 : i32
    %c0_i32_1 = arith.constant 0 : i32
    return %c0_i32, %c0_i32_0 : i32, i32
  }
  func.func @transform_7(%arg0: i32) -> (i32, i32) {
    %c0_i32 = arith.constant 0 : i32
    %c0_i32_0 = arith.constant 0 : i32
    %c0_i32_1 = arith.constant 0 : i32
    return %c0_i32, %c0_i32_0 : i32, i32
  }
  func.func @transform_8(%arg0: i32) -> (i32, i32) {
    %c0_i32 = arith.constant 0 : i32
    %c0_i32_0 = arith.constant 0 : i32
    %c0_i32_1 = arith.constant 0 : i32
    return %c0_i32, %c0_i32_0 : i32, i32
  }
  func.func @transform_9(%arg0: i32) -> (i32, i32) {
    %c0_i32 = arith.constant 0 : i32
    %c0_i32_0 = arith.constant 0 : i32
    return %arg0, %c0_i32 : i32, i32
  }
}

</mosaic_0001>

<bundles_post_ra>
// kernel: tpu_custom_call.1
= control target key start
LH: loop header
LB: loop body
LE: loop exit
PB: predicated region body
PF: predicated region fallthrough
CT: control target
= control target key end

     0   :  { %14 = vsyncpa [#allocation3], 0  ;;  %s1280_s0 = inlined_call_operand.hbm [shape: f32[8,365], index: 0, kind: input, shape index: {}]   ;;  %s1281_s1 = inlined_call_operand.hbm [shape: bf16[365,128], index: 1, kind: input, shape index: {}]   ;;  %s1282_s2 = inlined_call_operand.vmem [shape: f32[1,128], index: 2, kind: input, shape index: {}]   ;;  %s1283_s3 = inlined_call_operand.hbm [shape: bf16[128,128], index: 3, kind: input, shape index: {}]   ;;  %s1284_s4 = inlined_call_operand.vmem [shape: f32[1,128], index: 4, kind: input, shape index: {}]   ;;  %s1285_s5 = inlined_call_operand.hbm [shape: bf16[128,128], index: 5, kind: input, shape index: {}]   ;;  %s1286_s6 = inlined_call_operand.vmem [shape: f32[1,128], index: 6, kind: input, shape index: {}]   ;;  %s1287_s7 = inlined_call_operand.hbm [shape: bf16[128,128], index: 7, kind: input, shape index: {}]   ;;  %s1288_s8 = inlined_call_operand.vmem [shape: f32[1,128], index: 8, kind: input, shape index: {}]   ;;  %s1289_s9 = inlined_call_operand.vmem [shape: f32[8,1], index: 9, kind: output, shape index: {}]  }
   0x1   :  { %15 = vsyncpa [#allocation5], 0 }
   0x2   :  { %16 = vsyncpa [#allocation8], 0  ;;  %s1094_s30 = smov [#allocation4]   ;;  %s978_s13 = scalar_lea.hbm %s1281_s1, 2944 }
   0x3   :  { %s32_s10 = sshll.u32 %s1094_s30, 4  ;;  %p979_p0 = scmp.ne.s32.totalorder %s1281_s1, %s978_s13  ;;  %s33_s10 = int_to_ptr.vmem [resolvable:$true] %s32_s10 }
   0x4   :  { %p982_p1 = scmp.lt.u32.totalorder %s978_s13, %s1281_s1 }
   0x6   :  { %p984_p2 = pnand %p982_p1, %p979_p0 }
   0x8   :  { %987 = shalt.err (!%p984_p2)
}
   0x9   :  { %s988_s18 = scalar_lea.vmem %s33_s10, 2944  ;;  %p993_p4 = scmp.lt.s32.totalorder %s33_s10, %s33_s10 }
   0xa   :  { %p989_p3 = scmp.ne.s32.totalorder %s33_s10, %s988_s18  ;;  %p994_p5 = scmp.lt.s32.totalorder %s988_s18, %s988_s18 }
   0xc   :  { %p995_p6 = por %p994_p5, %p993_p4 }
   0xe   :  { %p996_p7 = pnand %p995_p6, %p989_p3 }
  0x10   :  { %999 = shalt.err (!%p996_p7)
}
  0x11   :  { %s1095_s19 = smov 64   ;;  %s1096_s20 = smov 4  }
  0x12   :  { %38 = dma.hbm_to_vmem [thread:$0]  %s1281_s1, 2944, %s33_s10, [#allocation5], %s1095_s19, %s1095_s19, %s1096_s20  }
  0x13   :  { %s1097_s23 = smov [#allocation7]   ;;  %s1098_s25 = smov [#allocation2]  }
  0x14   :  { %s60_s24 = sshll.u32 %s1097_s23, 4  ;;  %s23_s26 = sshll.u32 %s1098_s25, 4  ;;  %s61_s24 = int_to_ptr.vmem [resolvable:$true] %s60_s24  ;;  %s24_s26 = int_to_ptr.vmem [resolvable:$true] %s23_s26 }
  0x15   :  { %s1000_s29 = scalar_lea.hbm %s1285_s5, 1024 }
  0x16   :  { %p1001_p8 = scmp.ne.s32.totalorder %s1285_s5, %s1000_s29  ;;  %p1004_p9 = scmp.lt.u32.totalorder %s1000_s29, %s1285_s5 }
  0x18   :  { %p1006_p10 = pnand %p1004_p9, %p1001_p8 }
  0x1a   :  { %1009 = shalt.err (!%p1006_p10)
}
  0x1b   :  { %s1010_s1 = scalar_lea.vmem %s61_s24, 1024  ;;  %p1015_p12 = scmp.lt.s32.totalorder %s61_s24, %s61_s24 }
  0x1c   :  { %p1011_p11 = scmp.ne.s32.totalorder %s61_s24, %s1010_s1  ;;  %p1016_p13 = scmp.lt.s32.totalorder %s1010_s1, %s1010_s1 }
  0x1e   :  { %p1017_p0 = por %p1016_p13, %p1015_p12 }
  0x20   :  { %p1018_p1 = pnand %p1017_p0, %p1011_p11 }
  0x22   :  { %1021 = shalt.err (!%p1018_p1)
}
  0x23   :  { %66 = dma.hbm_to_vmem [thread:$0]  %s1285_s5, 1024, %s61_s24, [#allocation8], %s1095_s19, %s1095_s19, %s1096_s20  }
  0x24   :  { %s1022_s17 = scalar_lea.hbm %s1280_s0, 384 }
  0x25   :  { %p1023_p2 = scmp.ne.s32.totalorder %s1280_s0, %s1022_s17  ;;  %p1026_p3 = scmp.lt.u32.totalorder %s1022_s17, %s1280_s0 }
  0x27   :  { %p1028_p4 = pnand %p1026_p3, %p1023_p2 }
  0x29   :  { %1031 = shalt.err (!%p1028_p4)
}
  0x2a   :  { %s1032_s25 = scalar_lea.vmem %s24_s26, 384  ;;  %p1037_p6 = scmp.lt.s32.totalorder %s24_s26, %s24_s26 }
  0x2b   :  { %p1033_p5 = scmp.ne.s32.totalorder %s24_s26, %s1032_s25  ;;  %p1038_p7 = scmp.lt.s32.totalorder %s1032_s25, %s1032_s25 }
  0x2d   :  { %p1039_p8 = por %p1038_p7, %p1037_p6 }
  0x2f   :  { %p1040_p9 = pnand %p1039_p8, %p1033_p5 }
  0x31   :  { %1043 = shalt.err (!%p1040_p9)
}
  0x32   :  { %26 = dma.hbm_to_vmem [thread:$0]  %s1280_s0, 384, %s24_s26, [#allocation3]  }
  0x33   :  { %s1099_s27 = smov [#allocation6]   ;;  %s1100_s29 = smov [#allocation9]  }
  0x34   :  { %s46_s28 = sshll.u32 %s1099_s27, 4  ;;  %s74_s30 = sshll.u32 %s1100_s29, 4  ;;  %s47_s28 = int_to_ptr.vmem [resolvable:$true] %s46_s28  ;;  %s75_s30 = int_to_ptr.vmem [resolvable:$true] %s74_s30 }
  0x35   :  { %s1044_s13 = scalar_lea.hbm %s1283_s3, 1024 }
  0x36   :  { %p1045_p10 = scmp.ne.s32.totalorder %s1283_s3, %s1044_s13  ;;  %p1048_p11 = scmp.lt.u32.totalorder %s1044_s13, %s1283_s3 }
  0x38   :  { %p1050_p12 = pnand %p1048_p11, %p1045_p10 }
  0x3a   :  { %1053 = shalt.err (!%p1050_p12)
}
  0x3b   :  { %s1054_s0 = scalar_lea.vmem %s47_s28, 1024  ;;  %p1059_p0 = scmp.lt.s32.totalorder %s47_s28, %s47_s28 }
  0x3c   :  { %p1055_p13 = scmp.ne.s32.totalorder %s47_s28, %s1054_s0  ;;  %p1060_p1 = scmp.lt.s32.totalorder %s1054_s0, %s1054_s0 }
  0x3e   :  { %p1061_p2 = por %p1060_p1, %p1059_p0 }
  0x40   :  { %p1062_p3 = pnand %p1061_p2, %p1055_p13 }
  0x42   :  { %1065 = shalt.err (!%p1062_p3)
}
  0x43   :  { %52 = dma.hbm_to_vmem [thread:$0]  %s1283_s3, 1024, %s47_s28, [#allocation5], %s1095_s19, %s1095_s19, %s1096_s20  }
  0x44   :  { %s1066_s21 = scalar_lea.hbm %s1287_s7, 1024 }
  0x45   :  { %p1067_p4 = scmp.ne.s32.totalorder %s1287_s7, %s1066_s21  ;;  %p1070_p5 = scmp.lt.u32.totalorder %s1066_s21, %s1287_s7 }
  0x47   :  { %p1072_p6 = pnand %p1070_p5, %p1067_p4 }
  0x49   :  { %1075 = shalt.err (!%p1072_p6)
}
  0x4a   :  { %s1076_s24 = scalar_lea.vmem %s75_s30, 1024  ;;  %p1081_p8 = scmp.lt.s32.totalorder %s75_s30, %s75_s30 }
  0x4b   :  { %p1077_p7 = scmp.ne.s32.totalorder %s75_s30, %s1076_s24  ;;  %p1082_p9 = scmp.lt.s32.totalorder %s1076_s24, %s1076_s24 }
  0x4d   :  { %p1083_p10 = por %p1082_p9, %p1081_p8 }
  0x4f   :  { %p1084_p11 = pnand %p1083_p10, %p1077_p7 }
  0x51   :  { %1087 = shalt.err (!%p1084_p11)
}
  0x52   :  { %80 = dma.hbm_to_vmem [thread:$0]  %s1287_s7, 1024, %s75_s30, [#allocation8], %s1095_s19, %s1095_s19, %s1096_s20  }
  0x53   :  { %1088 = dma.done.wait [#allocation3], 384  }
  0x54   :  { %1089 = vsyncadd [#allocation3], 4294966912 }
  0x55   :  { %1090 = dma.done.wait [#allocation5], 3968  }
  0x56   :  { %1091 = vsyncadd [#allocation5], 4294963328 }
  0x57   :  { %1092 = dma.done.wait [#allocation8], 2048  }
  0x58   :  { %1093 = vsyncadd [#allocation8], 4294965248  ;;  %v1101_v0 = vmov 0.0   ;;  %vm1102_vm0 = vmmov 0   ;;  %v931_v1 = vld [vmem:[#allocation4 + $0x40] sm:$0xff]   ;;  %v933_v3 = vld [vmem:[#allocation4 + $0x48] sm:$0xff]  }
  0x59   :  { %843 = vmatprep.subr.bf16.mxu1 %v1101_v0  ;;  %857 = vmatprep.mubr.msk.bf16.mxu1 %vm1102_vm0, %v1101_v0  ;;  %v932_v2 = vld [vmem:[#allocation4] sm:$0xff]   ;;  %v934_v4 = vld [vmem:[#allocation4 + $0x8] sm:$0xff]   ;;  %v936_v6 = vld [vmem:[#allocation4 + $0x50] sm:$0xff]   ;;  %vm299_vm1 = vcmask 1045504   ;;  %vm300_vm2 = vcmask 1046528   ;;  %v1103_v19 = vmov 65535  }
  0x5a   :  { %786 = vmatprep.subr.bf16.mxu0 %v931_v1  ;;  %v935_v5 = vld [vmem:[#allocation4 + $0x80] sm:$0xff]   ;;  %v937_v7 = vld [vmem:[#allocation4 + $0x10] sm:$0xff]   ;;  %v938_v8 = vld [vmem:[#allocation4 + $0x88] sm:$0xff]   ;;  %v301_v20 = vsel %vm299_vm1, 4294967295, %v1103_v19  ;;  %vm295_vm3 = vcmask 891904   ;;  %vm725_vm4 = vcmask 7168  }
  0x5b   :  { %787 = vmatpush3.bf16.msra.mxu0 %v932_v2  ;;  %844 = vmatpush3.bf16.msra.mxu1 %v935_v5  ;;  %v939_v9 = vld [vmem:[#allocation4 + $0x58] sm:$0xff]   ;;  %v941_v10 = vld [vmem:[#allocation4 + $0x90] sm:$0xff]   ;;  %v942_v12 = vld [vmem:[#allocation4 + $0x60] sm:$0xff]   ;;  %v302_v26 = vsel %vm300_vm2, %v301_v20, 0 }
  0x5c   :  { %788 = vmatprep.subr.bf16.mxu0 %v933_v3  ;;  %845 = vmatprep.subr.bf16.mxu1 %v1101_v0  ;;  %v940_v11 = vld [vmem:[#allocation4 + $0x18] sm:$0xff]   ;;  %v943_v14 = vld [vmem:[#allocation4 + $0x20] sm:$0xff]   ;;  %v945_v15 = vld [vmem:[#allocation4 + $0x68] sm:$0xff]  }
  0x5d   :  { %v944_v13 = vld [vmem:[#allocation4 + $0x98] sm:$0xff]   ;;  %v947_v16 = vld [vmem:[#allocation4 + $0xa0] sm:$0xff]   ;;  %v946_v17 = vld [vmem:[#allocation4 + $0x28] sm:$0xff]  }
  0x5e   :  { %v948_v18 = vld [vmem:[#allocation4 + $0x70] sm:$0xff]   ;;  %v950_v21 = vld [vmem:[#allocation4 + $0xa8] sm:$0xff]   ;;  %v951_v27 = vld [vmem:[#allocation4 + $0x78] sm:$0xff]  }
  0x5f   :  { %789 = vmatpush3.bf16.msra.mxu0 %v934_v4  ;;  %846 = vmatpush3.bf16.msra.mxu1 %v938_v8  ;;  %v100_v22 = vld [vmem:[#allocation2 + $0x8] sm:$0xff]  ;;  %v952_v28 = vld [vmem:[#allocation4 + $0x38] sm:$0xff]   ;;  %v99_v31 = vld [vmem:[#allocation2] sm:$0xff] }
  0x60   :  { %790 = vmatprep.subr.bf16.mxu0 %v936_v6  ;;  %847 = vmatprep.subr.bf16.mxu1 %v1101_v0  ;;  %v949_v23 = vld [vmem:[#allocation4 + $0x30] sm:$0xff]   ;;  %v103_v24 = vpack.c.bf16 %v100_v22, %v100_v22  ;;  %v101_v30 = vld [vmem:[#allocation2 + $0x10] sm:$0xff]  ;;  %v102_v34 = vpack.c.bf16 %v99_v31, %v99_v31  ;;  %v955_v35 = vld [vmem:[#allocation6 + $0x8] sm:$0xff]  }
  0x61   :  { %v953_v25 = vld [vmem:[#allocation4 + $0xb0] sm:$0x7f]   ;;  %v954_v32 = vld [vmem:[#allocation6] sm:$0xff]   ;;  %v104_v33 = vpack.c.bf16 %v101_v30, %v101_v30  ;;  %v956_v36 = vld [vmem:[#allocation6 + $0x10] sm:$0xff]  }
  0x62   :  { %338 = vmatprep.mubr.bf16.mxu0 %v103_v24  ;;  %v304_v29 = vand.u32 %v953_v25, %v302_v26  ;;  %v957_v37 = vld [vmem:[#allocation6 + $0x18] sm:$0xff]   ;;  %v958_v38 = vld [vmem:[#allocation6 + $0x20] sm:$0xff]   ;;  %v959_v39 = vld [vmem:[#allocation6 + $0x28] sm:$0xff]  }
  0x63   :  { %791 = vmatpush3.bf16.msra.mxu0 %v937_v7  ;;  %848 = vmatpush3.bf16.msra.mxu1 %v941_v10  ;;  %v960_v40 = vld [vmem:[#allocation6 + $0x30] sm:$0xff]   ;;  %v961_v41 = vld [vmem:[#allocation6 + $0x38] sm:$0xff]   ;;  %v962_v42 = vld [vmem:[#allocation7] sm:$0xff]  }
  0x64   :  { %792 = vmatprep.subr.bf16.mxu0 %v939_v9  ;;  %849 = vmatprep.subr.bf16.mxu1 %v1101_v0  ;;  %v963_v43 = vld [vmem:[#allocation7 + $0x8] sm:$0xff]   ;;  %v964_v44 = vld [vmem:[#allocation7 + $0x10] sm:$0xff]   ;;  %v965_v45 = vld [vmem:[#allocation7 + $0x18] sm:$0xff]  }
  0x65   :  { %v966_v46 = vld [vmem:[#allocation7 + $0x20] sm:$0xff]   ;;  %v967_v47 = vld [vmem:[#allocation7 + $0x28] sm:$0xff]   ;;  %v968_v62 = vld [vmem:[#allocation7 + $0x30] sm:$0xff]  }
  0x66   :  { %v734_v52 = vld [vmem:[%s1282_s2] ss:$0 sm:$0xff]  ;;  %v969_v63 = vld [vmem:[#allocation7 + $0x38] sm:$0xff]   ;;  %v970_v1 = vld [vmem:[#allocation9] sm:$0xff]  }
  0x67   :  { %793 = vmatpush3.bf16.msra.mxu0 %v940_v11  ;;  %850 = vmatpush3.bf16.msra.mxu1 %v944_v13  ;;  %v971_v2 = vld [vmem:[#allocation9 + $0x8] sm:$0xff]   ;;  %v972_v3 = vld [vmem:[#allocation9 + $0x10] sm:$0xff]   ;;  %v973_v4 = vld [vmem:[#allocation9 + $0x18] sm:$0xff]  }
  0x68   :  { %794 = vmatprep.subr.bf16.mxu0 %v942_v12  ;;  %851 = vmatprep.subr.bf16.mxu1 %v1101_v0  ;;  %v974_v5 = vld [vmem:[#allocation9 + $0x20] sm:$0xff]   ;;  %v975_v6 = vld [vmem:[#allocation9 + $0x28] sm:$0xff]  }
  0x69   :  { %v759_v7 = vld [vmem:[%s1284_s4] ss:$0 sm:$0xff] }
  0x6a   :  { %v777_v25 = vld [vmem:[%s1288_s8] ss:$0 sm:$0xff] }
  0x6b   :  { %795 = vmatpush3.bf16.msra.mxu0 %v943_v14  ;;  %852 = vmatpush3.bf16.msra.mxu1 %v947_v16  ;;  %v977_v16 = vld [vmem:[#allocation9 + $0x38] sm:$0xff]  }
  0x6c   :  { %796 = vmatprep.subr.bf16.mxu0 %v945_v15  ;;  %853 = vmatprep.subr.bf16.mxu1 %v1101_v0  ;;  %v976_v15 = vld [vmem:[#allocation9 + $0x30] sm:$0xff]  }
  0x6f   :  { %797 = vmatpush3.bf16.msra.mxu0 %v946_v17  ;;  %854 = vmatpush3.bf16.msra.mxu1 %v950_v21  ;;  %v768_v17 = vld [vmem:[%s1286_s6] ss:$0 sm:$0xff] }
  0x70   :  { %798 = vmatprep.subr.bf16.mxu0 %v948_v18  ;;  %855 = vmatprep.subr.bf16.mxu1 %v1101_v0 }
  0x73   :  { %799 = vmatpush3.bf16.msra.mxu0 %v949_v23  ;;  %856 = vmatpush3.bf16.msra.mxu1 %v304_v29 }
  0x74   :  { %800 = vmatprep.subr.bf16.mxu0 %v951_v27  ;;  %861 = vmatprep.subr.bf16.mxu1 %v1101_v0 }
  0x76   :  { %858 = vmatmul.mubr.msk.bf16.vlgmr.msra.gmra.mrb[0].mxu1 %vm295_vm3, %v104_v33 }
  0x77   :  { %801 = vmatpush3.bf16.msra.mxu0 %v952_v28  ;;  %862 = vmatpush3.bf16.msra.mxu1 %v954_v32 }
  0x78   :  { %881 = vmatprep.subr.bf16.mxu0 %v1101_v0  ;;  %863 = vmatprep.subr.bf16.mxu1 %v1101_v0 }
  0x79   :  { %877 = vmatprep.mubr.msk.bf16.mxu1 %vm1102_vm0, %v1101_v0 }
  0x7a   :  { %339 = vmatmul.mubr.bf16.vlgmr.msra.gmra.mrb[0].mxu0 %v102_v34 }
  0x7b   :  { %897 = vmatprep.mubr.msk.bf16.mxu0 %vm1102_vm0, %v1101_v0  ;;  %864 = vmatpush3.bf16.msra.mxu1 %v955_v35 }
  0x7c   :  { %865 = vmatprep.subr.bf16.mxu1 %v1101_v0  ;;  %882 = vmatpush3.bf16.msra.mxu0 %v962_v42 }
  0x7d   :  { %883 = vmatprep.subr.bf16.mxu0 %v1101_v0 }
  0x7f   :  { %866 = vmatpush3.bf16.msra.mxu1 %v956_v36 }
  0x80   :  { %867 = vmatprep.subr.bf16.mxu1 %v1101_v0  ;;  %884 = vmatpush3.bf16.msra.mxu0 %v963_v43 }
  0x81   :  { %885 = vmatprep.subr.bf16.mxu0 %v1101_v0 }
  0x83   :  { %868 = vmatpush3.bf16.msra.mxu1 %v957_v37 }
  0x84   :  { %869 = vmatprep.subr.bf16.mxu1 %v1101_v0  ;;  %886 = vmatpush3.bf16.msra.mxu0 %v964_v44 }
  0x85   :  { %887 = vmatprep.subr.bf16.mxu0 %v1101_v0 }
  0x87   :  { %870 = vmatpush3.bf16.msra.mxu1 %v958_v38 }
  0x88   :  { %871 = vmatprep.subr.bf16.mxu1 %v1101_v0  ;;  %888 = vmatpush3.bf16.msra.mxu0 %v965_v45 }
  0x89   :  { %889 = vmatprep.subr.bf16.mxu0 %v1101_v0 }
  0x8b   :  { %872 = vmatpush3.bf16.msra.mxu1 %v959_v39 }
  0x8c   :  { %873 = vmatprep.subr.bf16.mxu1 %v1101_v0  ;;  %890 = vmatpush3.bf16.msra.mxu0 %v966_v46 }
  0x8d   :  { %891 = vmatprep.subr.bf16.mxu0 %v1101_v0 }
  0x8f   :  { %874 = vmatpush3.bf16.msra.mxu1 %v960_v40 }
  0x90   :  { %875 = vmatprep.subr.bf16.mxu1 %v1101_v0  ;;  %892 = vmatpush3.bf16.msra.mxu0 %v967_v47 }
  0x91   :  { %893 = vmatprep.subr.bf16.mxu0 %v1101_v0 }
  0x93   :  { %876 = vmatpush3.bf16.msra.mxu1 %v961_v41 }
  0x94   :  { %901 = vmatprep.subr.bf16.mxu1 %v1101_v0  ;;  %894 = vmatpush3.bf16.msra.mxu0 %v968_v62 }
  0x95   :  { %895 = vmatprep.subr.bf16.mxu0 %v1101_v0 }
  0x98   :  { %896 = vmatpush3.bf16.msra.mxu0 %v969_v63 }
 0x149   :  { %v380_v48 = vpop.f32.mrb[0].mxu1 }
 0x14a   :  { %v859_v50 = vpop.f32.mrb[1].mxu1 }
 0x14b   :  { %v383_v53 = vpop.f32.mrb[2].mxu1 }
 0x14c   :  { %v860_v56 = vpop.f32.mrb[3].mxu1 }
 0x14d   :  { %v802_v49 = vpop.f32.mrb[0].mxu0 }
 0x14e   :  { %v803_v51 = vpop.f32.mrb[1].mxu0 }
 0x14f   :  { %v804_v54 = vadd.f32 %v803_v51, %v802_v49  ;;  %v805_v55 = vpop.f32.mrb[2].mxu0 }
 0x150   :  { %v806_v57 = vpop.f32.mrb[3].mxu0 }
 0x151   :  { %v341_v58 = vadd.f32 %v804_v54, %v734_v52 }
 0x153   :  { %v381_v59 = vadd.f32 %v380_v48, %v341_v58 }
 0x155   :  { %v386_v60 = vmax.f32 %v381_v59, 0.0 }
 0x157   :  { %v387_v61 = vpack.c.bf16 %v386_v60, %v386_v60 }
 0x159   :  { %878 = vmatmul.mubr.bf16.vlgmr.msra.gmra.mrb[4].mxu1 %v387_v61 }
 0x15a   :  { %917 = vmatprep.mubr.msk.bf16.mxu1 %vm1102_vm0, %v1101_v0  ;;  %902 = vmatpush3.bf16.msra.mxu1 %v970_v1 }
 0x15b   :  { %903 = vmatprep.subr.bf16.mxu1 %v1101_v0 }
 0x15e   :  { %904 = vmatpush3.bf16.msra.mxu1 %v971_v2 }
 0x15f   :  { %905 = vmatprep.subr.bf16.mxu1 %v1101_v0 }
 0x162   :  { %906 = vmatpush3.bf16.msra.mxu1 %v972_v3 }
 0x163   :  { %907 = vmatprep.subr.bf16.mxu1 %v1101_v0 }
 0x166   :  { %908 = vmatpush3.bf16.msra.mxu1 %v973_v4 }
 0x167   :  { %909 = vmatprep.subr.bf16.mxu1 %v1101_v0 }
 0x16a   :  { %910 = vmatpush3.bf16.msra.mxu1 %v974_v5 }
 0x16b   :  { %911 = vmatprep.subr.bf16.mxu1 %v1101_v0 }
 0x16e   :  { %912 = vmatpush3.bf16.msra.mxu1 %v975_v6 }
 0x16f   :  { %913 = vmatprep.subr.bf16.mxu1 %v1101_v0 }
 0x172   :  { %914 = vmatpush3.bf16.msra.mxu1 %v976_v15 }
 0x173   :  { %915 = vmatprep.subr.bf16.mxu1 %v1101_v0 }
 0x176   :  { %916 = vmatpush3.bf16.msra.mxu1 %v977_v16 }
 0x22c   :  { %v493_v8 = vpop.f32.mrb[4].mxu1 }
 0x22d   :  { %v494_v9 = vadd.f32 %v759_v7, %v493_v8  ;;  %v879_v10 = vpop.f32.mrb[5].mxu1 }
 0x22e   :  { %v496_v11 = vpop.f32.mrb[6].mxu1 }
 0x22f   :  { %v499_v12 = vmax.f32 %v494_v9, 0.0  ;;  %v880_v13 = vpop.f32.mrb[7].mxu1 }
 0x231   :  { %v500_v14 = vpack.c.bf16 %v499_v12, %v499_v12 }
 0x233   :  { %898 = vmatmul.mubr.bf16.vlgmr.msra.gmra.mrb[4].mxu0 %v500_v14 }
 0x306   :  { %v606_v18 = vpop.f32.mrb[4].mxu0 }
 0x307   :  { %v607_v19 = vadd.f32 %v768_v17, %v606_v18  ;;  %v899_v20 = vpop.f32.mrb[5].mxu0 }
 0x308   :  { %v609_v21 = vpop.f32.mrb[6].mxu0 }
 0x309   :  { %v612_v22 = vmax.f32 %v607_v19, 0.0  ;;  %v900_v23 = vpop.f32.mrb[7].mxu0 }
 0x30b   :  { %v613_v24 = vpack.c.bf16 %v612_v22, %v612_v22 }
 0x30d   :  { %918 = vmatmul.mubr.bf16.vlgmr.msra.gmra.mrb[8].mxu1 %v613_v24 }
 0x3e0   :  { %v719_v26 = vpop.f32.mrb[8].mxu1 }
 0x3e1   :  { %v720_v0 = vadd.f32 %v777_v25, %v719_v26  ;;  %v919_v27 = vpop.f32.mrb[9].mxu1 }
 0x3e2   :  { %v722_v28 = vpop.f32.mrb[10].mxu1 }
 0x3e3   :  { %726 = vst.msk [vmem:[%s1289_s9] sm:$0xff] %vm725_vm4, %v720_v0  ;;  %v920_v29 = vpop.f32.mrb[11].mxu1 }
 0x3e4   :  { %731 = vsyncpa [#allocation3], 1 }
 0x3e5   :  { %732 = vsyncpa [#allocation5], 1 }
 0x3e6   :  { %733 = vsyncpa [#allocation8], 1 }

</bundles_post_ra>
